<compile_context>
chip_gen: v7x
topology: tpu7x:2x2x1
jax: 0.10.0
libtpu: 0.0.40
codegen_flags: <defaults>
</compile_context>

<pallas_src>
import math
import jax
import jax.numpy as jnp
from jax.experimental import pallas as pl
from jax.experimental.pallas import tpu as pltpu

LANE = 128


def _round_up(x: int, m: int) -> int:
    return ((x + m - 1) // m) * m


def _largest_tile(padded: int, max_tile: int) -> int:
    """Largest multiple of 128 that divides `padded` and is <= max_tile."""
    m = padded // LANE
    for d in range(min(m, max_tile // LANE), 0, -1):
        if m % d == 0:
            return d * LANE
    return LANE


def _vmem_plan():
    """(weight-tile budget, scoped vmem_limit_bytes), chip-aware."""
    phys = None
    try:
        phys = pltpu.get_tpu_info().vmem_capacity_bytes
    except Exception:
        phys = None
    if phys is not None and phys >= 96 * 1024 * 1024:
        # v5e / v6e: 128 MiB physical VMEM -> bigger resident tiles.
        return 10 * 1024 * 1024, 64 * 1024 * 1024
    # v7x (64 MiB / TC) or unknown chip: stay conservative.
    return 4 * 1024 * 1024, 32 * 1024 * 1024


# ---------------------------------------------------------------------------
# Kernels
# ---------------------------------------------------------------------------
def _vl_kernel_single_k(x_ref, w_ref, b_ref, o_ref):
    # x: (Eb, Bblk, K), w: (Eb, K, tn), b: (Eb, 1, tn), o: (Eb, Bblk, tn)
    prod = jnp.einsum("ebi,eio->ebo", x_ref[...], w_ref[...],
                      preferred_element_type=jnp.float32)
    o_ref[...] = (prod + b_ref[...].astype(jnp.float32)).astype(o_ref.dtype)


def _vl_kernel_multi_k(x_ref, w_ref, b_ref, o_ref, acc_ref):
    # Same shapes as above plus acc_ref: (Eb, Bblk, tn) f32 scratch.
    k = pl.program_id(3)
    prod = jnp.einsum("ebi,eio->ebo", x_ref[...], w_ref[...],
                      preferred_element_type=jnp.float32)

    @pl.when(k == 0)
    def _init():
        acc_ref[...] = prod

    @pl.when(k > 0)
    def _accumulate():
        acc_ref[...] += prod

    @pl.when(k == pl.num_programs(3) - 1)
    def _finalize():
        o_ref[...] = (acc_ref[...] + b_ref[...].astype(jnp.float32)).astype(o_ref.dtype)


# ---------------------------------------------------------------------------
# Wrapper
# ---------------------------------------------------------------------------
def vectorized_linear(x, weight, bias, *, compute_dtype=None):
    """x: (E, B, IN), weight: (E, IN, OUT), bias: (E, 1, OUT) -> (E, B, OUT)."""
    E, B, IN = x.shape
    Ew, INw, OUT = weight.shape
    assert Ew == E and INw == IN and bias.shape == (E, 1, OUT)
    out_dtype = x.dtype

    # NOTE: for production, store weights in compute_dtype up front; a per-call
    # astype is an extra full HBM pass over the weight tensor.
    if compute_dtype is not None:
        if x.dtype != compute_dtype:
            x = x.astype(compute_dtype)
        if weight.dtype != compute_dtype:
            weight = weight.astype(compute_dtype)

    x_item = jnp.dtype(x.dtype).itemsize
    w_item = jnp.dtype(weight.dtype).itemsize
    b_item = jnp.dtype(bias.dtype).itemsize
    o_item = jnp.dtype(out_dtype).itemsize

    w_budget, vmem_limit = _vmem_plan()

    # --- K (contraction) axis: no tiling / no padding for modest IN ---------
    if IN <= 1024:
        INp, tk, nk = IN, IN, 1          # block == full dim (layout rule OK)
    else:
        INp = _round_up(IN, LANE)
        tk = _largest_tile(INp, 512)
        nk = INp // tk

    # --- OUT axis: keep the full row (contiguous weight DMA) when it fits ---
    if OUT <= 1024:
        OUTp, tn, nj = OUT, OUT, 1
    else:
        OUTp = _round_up(OUT, LANE)
        tn = _largest_tile(OUTp, 512)
        nj = OUTp // tn

    # --- B axis: only tile (and pad) when B is large -------------------------
    if B <= 512:
        Bp, Bblk, nb = B, B, 1
    else:
        Bblk = 256
        Bp = _round_up(B, Bblk)
        nb = Bp // Bblk

    # --- ensemble block: amortize per-step overhead under VMEM constraints ---
    def _vmem_bytes(eb):
        v = 0
        v += 2 * eb * Bblk * tk * x_item      # x tile, double-buffered
        v += 2 * eb * tk * tn * w_item        # weight tile
        v += 2 * eb * tn * b_item             # bias tile
        v += 2 * eb * Bblk * tn * o_item      # out tile
        if nk > 1:
            v += eb * Bblk * tn * 4           # f32 accumulator scratch
        return v

    max_parallel = E * nb * nj
    need_parallel = 2 if max_parallel >= 2 else 1   # keep both v7x TCs busy
    Eb = 1
    for cand in range(E, 0, -1):
        if E % cand:
            continue
        if (E // cand) * nb * nj < need_parallel:
            continue
        if cand * tk * tn * w_item > w_budget:
            continue
        if _vmem_bytes(cand) > int(0.85 * vmem_limit):
            continue
        Eb = cand
        break

    # --- pad only what tiling forces (usually nothing) -----------------------
    xp = x
    if Bp != B or INp != IN:
        xp = jnp.pad(x, ((0, 0), (0, Bp - B), (0, INp - IN)))
    wp = weight
    if INp != IN or OUTp != OUT:
        wp = jnp.pad(weight, ((0, 0), (0, INp - IN), (0, OUTp - OUT)))
    bp = bias
    if OUTp != OUT:
        bp = jnp.pad(bias, ((0, 0), (0, 0), (0, OUTp - OUT)))

    grid = (E // Eb, nb, nj, nk)

    if nk == 1:
        kernel = _vl_kernel_single_k
        scratch = ()
    else:
        kernel = _vl_kernel_multi_k
        scratch = (pltpu.VMEM((Eb, Bblk, tn), jnp.float32),)

    out = pl.pallas_call(
        kernel,
        out_shape=jax.ShapeDtypeStruct((E, Bp, OUTp), out_dtype),
        grid_spec=pltpu.PrefetchScalarGridSpec(
            num_scalar_prefetch=0,
            grid=grid,
            in_specs=[
                pl.BlockSpec((Eb, Bblk, tk), lambda e, b, j, k: (e, b, k)),
                pl.BlockSpec((Eb, tk, tn), lambda e, b, j, k: (e, k, j)),
                pl.BlockSpec((Eb, 1, tn), lambda e, b, j, k: (e, 0, j)),
            ],
            out_specs=pl.BlockSpec((Eb, Bblk, tn), lambda e, b, j, k: (e, b, j)),
            scratch_shapes=scratch,
        ),
        compiler_params=pltpu.CompilerParams(
            dimension_semantics=("parallel", "parallel", "parallel", "arbitrary"),
            vmem_limit_bytes=vmem_limit,
        ),
    )(xp, wp, bp)

    if Bp != B or OUTp != OUT:
        out = out[:, :B, :OUT]
    return out


def init_params(key, in_features, out_features, ensemble_size, dtype=jnp.float32):
    """Mirror PyTorch reset_parameters(): kaiming_uniform_(a=sqrt(5)) per member
    -> bound = 1/sqrt(fan_in); bias ~ U(-1/sqrt(fan_in), 1/sqrt(fan_in))."""
    kw, kb = jax.random.split(key)
    fan_in = in_features
    w_bound = math.sqrt(1.0 / fan_in)
    b_bound = 1.0 / math.sqrt(fan_in)
    weight = jax.random.uniform(
        kw, (ensemble_size, in_features, out_features), dtype, -w_bound, w_bound)
    bias = jax.random.uniform(
        kb, (ensemble_size, 1, out_features), dtype, -b_bound, b_bound)
    return weight, bias


if __name__ == "__main__":
    key = jax.random.PRNGKey(0)

    # --- test 1: small shapes, single-K path, no padding at all -------------
    E, B, IN, OUT = 4, 8, 32, 32
    k1, k2, key = jax.random.split(key, 3)
    x = jax.random.normal(k1, (E, B, IN), jnp.float32)
    weight, bias = init_params(k2, IN, OUT, E)
    ref = jnp.einsum("ebi,eio->ebo", x, weight) + bias

    out = jax.block_until_ready(vectorized_linear(x, weight, bias))
    assert out.shape == (E, B, OUT)
    assert jnp.allclose(out, ref, atol=2e-4, rtol=2e-4)

    # bf16 weight/activation streaming path (f32 accumulation)
    out_bf16 = jax.block_until_ready(
        vectorized_linear(x, weight, bias, compute_dtype=jnp.bfloat16))
    assert out_bf16.shape == (E, B, OUT)
    assert jnp.allclose(out_bf16, ref, atol=5e-2, rtol=5e-2)

    # --- test 2: odd ensemble size, non-128 dims (full-dim blocks, no pad) ---
    E2, B2, IN2, OUT2 = 3, 8, 24, 48
    k1, k2, key = jax.random.split(key, 3)
    x2 = jax.random.normal(k1, (E2, B2, IN2), jnp.float32)
    w2, b2 = init_params(k2, IN2, OUT2, E2)
    ref2 = jnp.einsum("ebi,eio->ebo", x2, w2) + b2
    out2 = jax.block_until_ready(vectorized_linear(x2, w2, b2))
    assert out2.shape == (E2, B2, OUT2)
    assert jnp.allclose(out2, ref2, atol=2e-4, rtol=2e-4)

    # --- test 3: large IN -> tiled K path with f32 accumulator scratch -------
    E3, B3, IN3, OUT3 = 4, 16, 2048, 256
    k1, k2, key = jax.random.split(key, 3)
    x3 = jax.random.normal(k1, (E3, B3, IN3), jnp.float32)
    w3, b3 = init_params(k2, IN3, OUT3, E3)
    ref3 = jnp.einsum("ebi,eio->ebo", x3, w3) + b3
    out3 = jax.block_until_ready(vectorized_linear(x3, w3, b3))
    assert out3.shape == (E3, B3, OUT3)
    assert jnp.allclose(out3, ref3, atol=2e-3, rtol=2e-3)

    print("KERNEL_OK")
</pallas_src>

<mosaic_0001>
module attributes {stable_mosaic.version = 11 : i64} {
  func.func @_vl_kernel_single_k(%arg0: i32, %arg1: i32, %arg2: i32, %arg3: i32, %arg4: memref<2x8x32xf32, #tpu.memory_space<vmem>>, %arg5: memref<2x32x32xf32, #tpu.memory_space<vmem>>, %arg6: memref<2x1x32xf32, #tpu.memory_space<vmem>>, %arg7: memref<2x8x32xf32, #tpu.memory_space<vmem>>) attributes {dimension_semantics = [#tpu.dimension_semantics<parallel>, #tpu.dimension_semantics<parallel>, #tpu.dimension_semantics<parallel>, #tpu.dimension_semantics<arbitrary>], iteration_bounds = array<i64: 2, 1, 1, 1>, scalar_prefetch = 0 : i64, scratch_operands = 0 : i64, tpu.core_type = #tpu.core_type<tc>, window_params = [{transform_indices = @transform_0, window_bounds = array<i64: 2, 8, 32>}, {transform_indices = @transform_1, window_bounds = array<i64: 2, 32, 32>}, {transform_indices = @transform_2, window_bounds = array<i64: 2, 1, 32>}, {transform_indices = @transform_3, window_bounds = array<i64: 2, 8, 32>}]} {
    %c0 = arith.constant 0 : index
    %c0_0 = arith.constant 0 : index
    %c0_1 = arith.constant 0 : index
    %0 = vector.load %arg4[%c0, %c0_0, %c0_1] : memref<2x8x32xf32, #tpu.memory_space<vmem>>, vector<2x8x32xf32>
    %c0_2 = arith.constant 0 : index
    %c0_3 = arith.constant 0 : index
    %c0_4 = arith.constant 0 : index
    %1 = vector.load %arg5[%c0_2, %c0_3, %c0_4] : memref<2x32x32xf32, #tpu.memory_space<vmem>>, vector<2x32x32xf32>
    "tpu.trace_start"() <{level = 10 : i32, message = "ebi,eio->ebo"}> : () -> ()
    %cst = arith.constant dense<0.000000e+00> : vector<2x8x32xf32>
    %2 = tpu.matmul %0, %1, %cst {dimension_numbers = #tpu.dot_dimension_numbers<[2], [1], [1], [2], [0, 0, 0, 1, 1, 2], [0], [0]>} : vector<2x8x32xf32>, vector<2x32x32xf32>, vector<2x8x32xf32> -> vector<2x8x32xf32>
    "tpu.trace_stop"() : () -> ()
    %c0_5 = arith.constant 0 : index
    %c0_6 = arith.constant 0 : index
    %c0_7 = arith.constant 0 : index
    %3 = vector.load %arg6[%c0_5, %c0_6, %c0_7] : memref<2x1x32xf32, #tpu.memory_space<vmem>>, vector<2x1x32xf32>
    %4 = vector.broadcast %3 : vector<2x1x32xf32> to vector<2x8x32xf32>
    %5 = arith.addf %2, %4 : vector<2x8x32xf32>
    %c0_8 = arith.constant 0 : index
    %c0_9 = arith.constant 0 : index
    %c0_10 = arith.constant 0 : index
    %6 = vector.load %arg7[%c0_8, %c0_9, %c0_10] : memref<2x8x32xf32, #tpu.memory_space<vmem>>, vector<2x8x32xf32>
    tpu.vector_store %arg7[%c0_8, %c0_9, %c0_10], %5 {strides = array<i32>} : memref<2x8x32xf32, #tpu.memory_space<vmem>>, vector<2x8x32xf32>,
    return
  }
  func.func @transform_0(%arg0: i32, %arg1: i32, %arg2: i32, %arg3: i32) -> (i32, i32, i32) {
    %c0_i32 = arith.constant 0 : i32
    return %arg0, %arg1, %arg3 : i32, i32, i32
  }
  func.func @transform_1(%arg0: i32, %arg1: i32, %arg2: i32, %arg3: i32) -> (i32, i32, i32) {
    %c0_i32 = arith.constant 0 : i32
    return %arg0, %arg3, %arg2 : i32, i32, i32
  }
  func.func @transform_2(%arg0: i32, %arg1: i32, %arg2: i32, %arg3: i32) -> (i32, i32, i32) {
    %c0_i32 = arith.constant 0 : i32
    %c0_i32_0 = arith.constant 0 : i32
    return %arg0, %c0_i32, %arg2 : i32, i32, i32
  }
  func.func @transform_3(%arg0: i32, %arg1: i32, %arg2: i32, %arg3: i32) -> (i32, i32, i32) {
    %c0_i32 = arith.constant 0 : i32
    return %arg0, %arg1, %arg2 : i32, i32, i32
  }
}

</mosaic_0001>

<bundles_post_ra>
// kernel: tpu_custom_call.1
= control target key start
LH: loop header
LB: loop body
LE: loop exit
PB: predicated region body
PF: predicated region fallthrough
CT: control target
= control target key end

     0   :  { %8 = vsyncpa [#allocation3], 0  ;;  %s1197_s0 = inlined_call_operand.hbm [shape: f32[4,8,32], index: 0, kind: input, shape index: {}]   ;;  %s1198_s1 = inlined_call_operand.hbm [shape: f32[4,32,32], index: 1, kind: input, shape index: {}]   ;;  %s1199_s2 = inlined_call_operand.vmem [shape: f32[4,1,32], index: 2, kind: input, shape index: {}]   ;;  %s1200_s3 = inlined_call_operand.hbm [shape: f32[4,8,32], index: 3, kind: output, shape index: {}]  }
   0x1   :  { %10 = vsyncpa [#allocation3 + $0x1], 0 }
   0x2   :  { %11 = vsyncpa [#allocation6], 0 }
   0x3   :  { %13 = vsyncpa [#allocation6 + $0x1], 0 }
   0x4   :  { %14 = vsyncpa [#allocation4], 0 }
   0x5   :  { %16 = vsyncpa [#allocation4 + $0x1], 0  ;;  %s950_s12 = smov 0   ;;  %s952_s13 = smov 0  }
   0x6   :  { %s954_s14 = smov 0   ;;  %s956_s15 = smov 0  }
   0x7   :  { %s958_s16 = smov 0   ;;  %s960_s17 = smov 0  }
   0x8 LB: > { %s625_s18 = sadd.s32 4294967295, %s918_s17   ;;  %s626_s19 = sadd.s32 4294967294, %s918_s17   ;;  %s918_s17 = sphi %s960_s17, %s22_s17   ;;  %s914_s16 = sphi %s958_s16, %s1218_s16   ;;  %s910_s15 = sphi %s956_s15, %s1217_s15   ;;  %s906_s14 = sphi %s954_s14, %s1216_s14   ;;  %s902_s13 = sphi %s952_s13, %s1215_s13   ;;  %s898_s12 = sphi %s950_s12, %s1214_s12  }
   0x9   : > { %s48_s20 = sadd.s32 1, %s914_s16  ;;  %s59_s21 = sadd.s32 1, %s906_s14 }
   0xa   : > { %p50_p0 = scmp.ge.s32.totalorder %s48_s20, 2  ;;  %p66_p1 = scmp.ne.s32.totalorder %s906_s14, %s902_s13 }
   0xb   : > { %p67_p2 = scmp.eq.s32.totalorder %s918_s17, 0  ;;  %p72_p3 = scmp.ne.s32.totalorder %s902_s13, %s898_s12 }
   0xc   : > { %s1220_s20 = smov (%p50_p0, %s48_s20), 0  ;;  %p73_p5 = scmp.eq.s32.totalorder %s625_s18, 0 }
   0xd   : > { %p991_p4 = por %p67_p2, %p66_p1  ;;  %s52_s23 = ssub.s32 %s914_s16, %s1220_s20 }
   0xe   : > { %p158_p6 = scmp.eq.s32.totalorder %s625_s18, 1  ;;  %p57_p7 = scmp.eq.s32.totalorder %s52_s23, 0 }
   0xf   : > { %p997_p8 = por %p73_p5, %p72_p3  ;;  %p164_p10 = scmp.eq.s32.totalorder %s626_s19, 1 }
  0x10   : > { %p1001_p9 = por %p158_p6, %p66_p1  ;;  %p715_p13 = scmp.lt.s32.totalorder %s918_s17, 2 }
  0x11   : > { %s1204_s24 = scalar_select %p997_p8, 1, 0 }
  0x12   : > { %s1205_s25 = scalar_select %p1001_p9, 1, 0 }
  0x13   : > { %s1006_s26 = scalar_select %p57_p7, %s906_s14, %s59_s21  }
  0x14   : > { %p1008_p11 = por %p164_p10, %p72_p3  ;;  %s1015_s28 = sand.u32 1, %s906_s14  }
  0x15   : > { %s629_s29 = sshll.u32 %s1015_s28, 4  ;;  %s650_s30 = sshll.u32 %s914_s16, 8 }
  0x16   : > { %s1206_s27 = scalar_select %p1008_p11, 1, 0 }
  0x17   : > { %s1022_s6 = scalar_lea.hbm %s1197_s0, %s650_s30  ;;  %s188_s7 = scalar_lea.vmem [#allocation2], %s629_s29 }
  0x18   : > { %s197_s8 = sshll.u32 %s188_s7, 4  ;;  %p1028_p0 = pnand %p715_p13, %p991_p4  ;;  %s1024_s8 = int_to_ptr.vmem [resolvable:$true] %s197_s8 }
  0x19   : > { %s185_s10 = scalar_lea.sflag [#allocation3], %s1015_s28  ;;  %s772_s11 = scalar_lea.hbm %s1022_s6, 256 }
  0x1a   : > { %p773_p2 = scmp.ne.s32.totalorder %s1022_s6, %s772_s11  ;;  %p774_p3 = pneg %p1028_p0 }
  0x1b   : > { %s777_s21 = scalar_lea.hbm %s1197_s0, 512  ;;  %p778_p4 = scmp.lt.u32.totalorder %s1022_s6, %s1197_s0 }
  0x1c   : > { %p775_p5 = pnand %p774_p3, %p773_p2  ;;  %p779_p7 = scmp.lt.u32.totalorder %s777_s21, %s772_s11 }
  0x1d   : > { %p781_p13 = scmp.lt.u32.totalorder %s772_s11, %s1022_s6 }
  0x1e   : > { %p776_p6 = pneg %p775_p5  ;;  %p780_p10 = por %p779_p7, %p778_p4 }
  0x20   : > { %p782_p12 = por %p781_p13, %p780_p10 }
  0x22   : > { %p783_p1 = pnand %p782_p12, %p776_p6 }
  0x24   : > { %786 = shalt.err (!%p783_p1)
}
  0x25   : > { %s787_s29 = scalar_lea.vmem %s1024_s8, 256  ;;  %s920_s30 = smov [#allocation2]  }
  0x26   : > { %p788_p2 = scmp.ne.s32.totalorder %s1024_s8, %s787_s29  ;;  %s792_s4 = sshll.u32 %s920_s30, 4  ;;  %s793_s4 = int_to_ptr.vmem [resolvable:$false] %s792_s4 }
  0x27   : > { %s794_s5 = scalar_lea.vmem %s793_s4, 512  ;;  %p795_p9 = scmp.lt.s32.totalorder %s1024_s8, %s793_s4 }
  0x28   : > { %p790_p5 = pnand %p788_p2, %p774_p3  ;;  %p796_p4 = scmp.lt.s32.totalorder %s794_s5, %s787_s29 }
  0x2a   : > { %p791_p11 = pneg %p790_p5  ;;  %p797_p7 = por %p796_p4, %p795_p9 }
  0x2c   : > { %p798_p10 = pnand %p797_p7, %p791_p11 }
  0x2e   : > { %801 = shalt.err (!%p798_p10)
}
  0x2f   : > { %s921_s7 = smov 128   ;;  %s922_s11 = smov 8  }
  0x30   : > { %707 = dma.hbm_to_vmem [thread:$0]  (!%p1028_p0), %s1022_s6, 256, %s1024_s8, %s185_s10, %s921_s7, %s921_s7, %s922_s11  }
  0x31   : > { %p241_p9 = scmp.lt.s32.totalorder %s918_s17, 3  ;;  %s632_s18 = sshll.u32 %s1015_s28, 6 }
  0x32   : > { %s652_s19 = sshll.u32 %s914_s16, 10  ;;  %p1208_p11 = scmp.ge.s32.totalorder %s918_s17, 1 }
  0x33   : > { %s1076_s29 = scalar_lea.hbm %s1198_s1, %s652_s19  ;;  %s211_s30 = scalar_lea.vmem [#allocation5], %s632_s18 }
  0x34   : > { %p1069_p12 = pnand %p1208_p11, %p241_p9  ;;  %s222_s4 = sshll.u32 %s211_s30, 4  ;;  %s1078_s4 = int_to_ptr.vmem [resolvable:$true] %s222_s4 }
  0x35   : > { %s208_s6 = scalar_lea.sflag [#allocation6], %s1015_s28  ;;  %s802_s8 = scalar_lea.hbm %s1076_s29, 1024 }
  0x36   : > { %p803_p1 = scmp.ne.s32.totalorder %s1076_s29, %s802_s8  ;;  %s807_s19 = scalar_lea.hbm %s1198_s1, 2048 }
  0x37   : > { %p808_p2 = scmp.lt.u32.totalorder %s1076_s29, %s1198_s1  ;;  %p809_p5 = scmp.lt.u32.totalorder %s807_s19, %s802_s8 }
  0x38   : > { %p805_p6 = pnand %p803_p1, %p774_p3  ;;  %p811_p7 = scmp.lt.u32.totalorder %s802_s8, %s1076_s29 }
  0x39   : > { %p810_p4 = por %p809_p5, %p808_p2 }
  0x3a   : > { %p806_p13 = pneg %p805_p6 }
  0x3b   : > { %p812_p10 = por %p811_p7, %p810_p4 }
  0x3d   : > { %p813_p9 = pnand %p812_p10, %p806_p13 }
  0x3f   : > { %816 = shalt.err (!%p813_p9)
}
  0x40   : > { %s817_s18 = scalar_lea.vmem %s1078_s4, 1024  ;;  %s923_s30 = smov [#allocation5]  }
  0x41   : > { %p818_p11 = scmp.ne.s32.totalorder %s1078_s4, %s817_s18  ;;  %s822_s10 = sshll.u32 %s923_s30, 4  ;;  %s823_s10 = int_to_ptr.vmem [resolvable:$false] %s822_s10 }
  0x42   : > { %s824_s5 = scalar_lea.vmem %s823_s10, 2048  ;;  %p825_p8 = scmp.lt.s32.totalorder %s1078_s4, %s823_s10 }
  0x43   : > { %p820_p1 = pnand %p818_p11, %p774_p3  ;;  %p826_p2 = scmp.lt.s32.totalorder %s824_s5, %s817_s18 }
  0x45   : > { %p821_p6 = pneg %p820_p1  ;;  %p827_p5 = por %p826_p2, %p825_p8 }
  0x47   : > { %p828_p4 = pnand %p827_p5, %p821_p6 }
  0x49   : > { %831 = shalt.err (!%p828_p4)
}
  0x4a   : > { %710 = dma.hbm_to_vmem [thread:$0]  (!%p1028_p0), %s1076_s29, 1024, %s1078_s4, %s208_s6, %s921_s7, %s921_s7, %s922_s11  }
  0x4b   : > { %245 = sbr.rel (%p1069_p12) target bundleno = 326 (0x146), region = 32  ;;  %s1112_s8 = sand.u32 (!%p1069_p12), 1, %s902_s13  }
  0x4c   : > { %s637_s19 = sshll.u32 (!%p1069_p12), %s1112_s8, 4  ;;  %s248_s9 = scalar_lea.sflag (!%p1069_p12), [#allocation3], %s1112_s8 }
  0x4d   : > { %s1118_s22 = scalar_lea.vmem (!%p1069_p12), [#allocation2], %s637_s19  ;;  %p1210_p8 = scmp.ne.s32.totalorder (!%p1069_p12), %s1204_s24, 0 }
  0x52   : > { %885 = dma.done.wait (%p1210_p8), %s248_s9, 256  }
  0x53   : > { %887 = vsyncadd (%p1210_p8), %s248_s9, 4294967040  ;;  %s638_s28 = sshll.u32 %s1112_s8, 6  ;;  %s257_s7 = scalar_lea.sflag [#allocation6], %s1112_s8 }
  0x54   : > { %s260_s11 = scalar_lea.vmem [#allocation5], %s638_s28 }
  0x55   : > { %889 = dma.done.wait (%p1210_p8), %s257_s7, 1024  }
  0x56   : > { %891 = vsyncadd (%p1210_p8), %s257_s7, 4294966272  ;;  %v924_v0 = vmov 0.0|0.0   ;;  %vm925_vm0 = vmmov 0   ;;  %v926_v1 = vmov 0.0   ;;  %v309_v2 = vld [vmem:[%s260_s11] sm:$0xff]  ;;  %v310_v3 = vld [vmem:[%s260_s11 + $0x8] sm:$0xff] }
  0x57   : > { %686 = vmatprep.subr.bf16.mxu0 %v924_v0  ;;  %692 = vmatprep.subr.bf16.mxu1 %v924_v0  ;;  %v313_v4 = vld [vmem:[%s260_s11 + $0x20] sm:$0xff]  ;;  %v687_v5 = vpack.c.bf16 %v310_v3, %v309_v2  ;;  %v314_v6 = vld [vmem:[%s260_s11 + $0x28] sm:$0xff]  ;;  %v311_v7 = vld [vmem:[%s260_s11 + $0x10] sm:$0xff]  ;;  %vm331_vm1 = vcmask 261120   ;;  %s640_s24 = sshll.u32 %s910_s15, 1  ;;  %s294_s6 = scalar_lea.vmem [#allocation7], %s637_s19 }
  0x58   : > { %672 = vmatprep.mubr.msk.f32.mxu0 %vm925_vm0, %v926_v1  ;;  %683 = vmatprep.mubr.msk.f32.mxu1 %vm925_vm0, %v926_v1  ;;  %v312_v8 = vld [vmem:[%s260_s11 + $0x18] sm:$0xff]  ;;  %v693_v9 = vpack.c.bf16 %v314_v6, %v313_v4  ;;  %v315_v10 = vld [vmem:[%s260_s11 + $0x30] sm:$0xff]  ;;  %p299_p0 = scmp.lt.s32.totalorder %s640_s24, 3  ;;  %s496_s23 = sshll.u32 %s294_s6, 4  ;;  %s1141_s23 = int_to_ptr.vmem [resolvable:$true] %s496_s23 }
  0x59   : > { %v316_v11 = vld [vmem:[%s260_s11 + $0x38] sm:$0xff]  ;;  %688 = vmatpush3.bf16.msra.mxu0 %v687_v5  ;;  %v690_v12 = vpack.c.bf16 %v312_v8, %v311_v7  ;;  %v307_v14 = vld [vmem:[%s1118_s22] sm:$0xff]  ;;  %s653_s18 = sshll.u32 %s910_s15, 8  ;;  %s481_s15 = scalar_lea.sflag [#allocation4], %s1112_s8 }
  0x5a   : > { %694 = vmatpush3.bf16.msra.mxu1 %v693_v9  ;;  %689 = vmatprep.subr.bf16.mxu0 %v924_v0  ;;  %v696_v13 = vpack.c.bf16 %v316_v11, %v315_v10  ;;  %v308_v15 = vld [vmem:[%s1118_s22 + $0x8] sm:$0xff]  ;;  %s1222_s24 = smov (!%p299_p0, %s640_s24), 3  ;;  %s1146_s5 = scalar_lea.hbm %s1200_s3, %s653_s18 }
  0x5b   : > { %695 = vmatprep.subr.bf16.mxu1 %v924_v0  ;;  %s304_s4 = scalar_lea.vmem %s1199_s2, %s1222_s24  ;;  %s832_s19 = scalar_lea.vmem %s1141_s23, 256 }
  0x5c   : > { %v641_v16 = vld [vmem:[%s304_s4] ss:$0 sm:$0xff]  ;;  %v642_v17 = vld [vmem:[%s304_s4 + $0x1] ss:$0 sm:$0xff]  ;;  %p833_p3 = scmp.ne.s32.totalorder %s1141_s23, %s832_s19  ;;  %p1211_p12 = scmp.ne.s32.totalorder %s1205_s25, 0 }
  0x5d   : > { %691 = vmatpush3.bf16.msra.mxu0 %v690_v12  ;;  %s927_s9 = smov [#allocation7]  }
  0x5e   : > { %697 = vmatpush3.bf16.msra.mxu1 %v696_v13  ;;  %p834_p13 = pnand %p833_p3, %p1211_p12  ;;  %s836_s22 = sshll.u32 %s927_s9, 4  ;;  %s837_s22 = int_to_ptr.vmem [resolvable:$false] %s836_s22 }
  0x5f   : > { %s838_s28 = scalar_lea.vmem %s837_s22, 512  ;;  %p839_p10 = scmp.lt.s32.totalorder %s1141_s23, %s837_s22 }
  0x60   : > { %673 = vmatmul.mubr.msk.f32.vlgmr.msra.gmra.mrb[0].mxu0 %vm331_vm1, %v307_v14  ;;  %p835_p7 = pneg %p834_p13  ;;  %p840_p9 = scmp.lt.s32.totalorder %s838_s28, %s832_s19 }
  0x61   : > { %684 = vmatmul.mubr.msk.f32.vlgmr.msra.gmra.mrb[0].mxu1 %vm331_vm1, %v308_v15 }
  0x62   : > { %p841_p11 = por %p840_p9, %p839_p10 }
  0x64   : > { %p842_p1 = pnand %p841_p11, %p835_p7 }
 0x133   : > { %v401_v18 = vpop.f32.mrb[0].mxu0 }
 0x134   : > { %v402_v19 = vadd.f32 %v641_v16, %v401_v18  ;;  %v474_v20 = vpop.f32.mrb[0].mxu1  ;;  %v674_v21 = vpop.f32.mrb[1].mxu0 }
 0x135   : > { %v475_v22 = vadd.f32 %v642_v17, %v474_v20  ;;  %v685_v23 = vpop.f32.mrb[1].mxu1 }
 0x136   : > { %478 = vst.msk [vmem:[%s294_s6] sm:$0xff] %vm331_vm1, %v402_v19 }
 0x137   : > { %479 = vst.msk [vmem:[%s294_s6 + $0x8] sm:$0xff] %vm331_vm1, %v475_v22 }
 0x138   : > { %845 = shalt.err (!%p842_p1)
}
 0x139   : > { %s846_s7 = scalar_lea.hbm %s1146_s5, 256  ;;  %s850_s21 = scalar_lea.hbm %s1200_s3, 512 }
 0x13a   : > { %p847_p6 = scmp.ne.s32.totalorder %s1146_s5, %s846_s7  ;;  %p851_p4 = scmp.lt.u32.totalorder %s1146_s5, %s1200_s3 }
 0x13b   : > { %p852_p8 = scmp.lt.u32.totalorder %s850_s21, %s846_s7  ;;  %p854_p3 = scmp.lt.u32.totalorder %s846_s7, %s1146_s5 }
 0x13c   : > { %p848_p2 = pnand %p847_p6, %p1211_p12 }
 0x13d   : > { %p853_p0 = por %p852_p8, %p851_p4 }
 0x13e   : > { %p849_p5 = pneg %p848_p2 }
 0x13f   : > { %p855_p13 = por %p854_p3, %p853_p0 }
 0x141   : > { %p856_p7 = pnand %p855_p13, %p849_p5 }
 0x143   : > { %859 = shalt.err (!%p856_p7)
}
 0x144   : > { %s928_s6 = smov 128   ;;  %s929_s18 = smov 8  }
 0x145   : > { %702 = dma.vmem_to_hbm [thread:$0]  (%p1211_p12), %s1141_s23, 256, %s1146_s5, %s481_s15, %s928_s6, %s928_s6, %s929_s18  }
 0x146 PF: > { %s511_s30 = sand.u32 1, %s898_s12   ;;  %p1212_p10 = scmp.ne.s32.totalorder %s1206_s27, 0 }
 0x147   : > { %p1213_p9 = scmp.ge.s32.totalorder %s918_s17, 2  ;;  %s512_s10 = scalar_lea.sflag [#allocation4], %s511_s30 }
 0x149   : > { %p712_p11 = pnand %p1213_p9, %p1212_p10 }
 0x14b   : > { %893 = dma.done.wait (!%p712_p11), %s512_s10, 256  }
 0x14c   : > { %895 = vsyncadd (!%p712_p11), %s512_s10, 4294967040  ;;  %s22_s17 = sadd.s32 1, %s918_s17   ;;  %s1214_s12 = smov %s902_s13 }
 0x14d   : > { %p19_p1 = scmp.ge.s32.totalorder %s22_s17, 4   ;;  %s1215_s13 = smov %s906_s14 }
 0x14e   : > { %s1216_s14 = smov %s1006_s26  ;;  %s1217_s15 = smov %s914_s16 }
 0x14f   : > { %s1218_s16 = smov %s1220_s20  ;;  %21 = sbr.rel (!%p19_p1) target bundleno = 8 (0x8), region = 93 }
 0x156   :  { %517 = vsyncpa [#allocation3], 1 }
 0x157   :  { %519 = vsyncpa [#allocation3 + $0x1], 1 }
 0x158   :  { %520 = vsyncpa [#allocation6], 1 }
 0x159   :  { %522 = vsyncpa [#allocation6 + $0x1], 1 }
 0x15a   :  { %523 = vsyncpa [#allocation4], 1 }
 0x15b   :  { %525 = vsyncpa [#allocation4 + $0x1], 1 }

</bundles_post_ra>
